<compile_context>
chip_gen: v5e
topology: v5e:2x2
jax: 0.10.0
libtpu: 0.0.40
codegen_flags: <defaults>
</compile_context>

<pallas_src>
from typing import NamedTuple, Optional

import jax
import jax.numpy as jnp
from jax.experimental import pallas as pl
from jax.experimental.pallas import tpu as pltpu


class AMISEConfig(NamedTuple):
    batch_size: int
    initial_value: Optional[float] = 1.0
    momentum: float = 0.9
    std_estimator: str = "within_cluster"


def _round_up(x: int, m: int) -> int:
    return ((x + m - 1) // m) * m


def _cdiv(a: int, b: int) -> int:
    return (a + b - 1) // b


# ---------------------------------------------------------------------------
# Pallas kernels (stream N; per-core partial accumulators live in the output
# blocks, which stay resident in VMEM across the "arbitrary" grid axis)
# ---------------------------------------------------------------------------

def _global_std_kernel(x_ref, sum_ref, sumsq_ref):
    """Accumulate per-column sum / sum-of-squares of the current N-tile.

    x_ref block: (TR, W) with W = fold*D (batch rows folded into lanes for
    lane density).  sum_ref / sumsq_ref: (1, W) per-core partials.
    """
    @pl.when(pl.program_id(1) == 0)
    def _init():
        sum_ref[...] = jnp.zeros_like(sum_ref)
        sumsq_ref[...] = jnp.zeros_like(sumsq_ref)

    x = x_ref[...].astype(jnp.float32)                       # (TR, W)
    sum_ref[...] += jnp.sum(x, axis=0, keepdims=True)        # (1, W)
    sumsq_ref[...] += jnp.sum(x * x, axis=0, keepdims=True)  # (1, W)


def _within_cluster_kernel(at_ref, x_ref, acc_ref):
    """One fused MXU matmul per N-tile:

        acc[K, 2D+1] += A^T[K, TN] @ [x, x*x, 1][TN, 2D+1]

    columns [0:D]  = sum_n a[n,k] x[n,d]      (-> centers)
            [D:2D] = sum_n a[n,k] x[n,d]^2    (-> E_k[x^2])
            [2D]   = sum_n a[n,k]             (-> freq)
    """
    @pl.when(pl.program_id(1) == 0)
    def _init():
        acc_ref[...] = jnp.zeros_like(acc_ref)

    at = at_ref[...].astype(jnp.float32)                     # (K, TN)
    x = x_ref[...].astype(jnp.float32)                       # (TN, D)
    ones = jnp.ones((x.shape[0], 1), jnp.float32)            # freq column
    x_aug = jnp.concatenate([x, x * x, ones], axis=-1)       # (TN, 2D+1)
    acc_ref[...] += jax.lax.dot_general(
        at, x_aug, (((1,), (0,)), ((), ())),                 # MXU-natural matmul
        preferred_element_type=jnp.float32)


# ---------------------------------------------------------------------------
# pallas_call wrappers
# ---------------------------------------------------------------------------

def global_std_pallas(inputs, factor, *, block_rows=2048, num_cores=2,
                      ingest_dtype=None):
    """factor * mean(std(inputs, axis=0, ddof=1)); streams the batch dim."""
    n, d = inputs.shape
    x = inputs if ingest_dtype is None else inputs.astype(ingest_dtype)

    # Fold batch rows into lanes for lane density (free row-major reshape).
    fold = max(1, 128 // max(d, 1))
    n_fold = _round_up(n, fold)
    if n_fold != n:                                          # zero rows are harmless
        x = jnp.pad(x, ((0, n_fold - n), (0, 0)))
    rows = n_fold // fold
    w = fold * d
    xw = x.reshape(rows, w)

    if rows <= block_rows:
        tr, cores, tiles_per_core, rows_pad = rows, 1, 1, rows
    else:
        tr = max(8, _round_up(min(block_rows, rows), 8))
        num_tiles = _cdiv(rows, tr)
        cores = num_cores if num_tiles >= num_cores else 1
        tiles_per_core = _cdiv(num_tiles, cores)
        rows_pad = cores * tiles_per_core * tr
        if rows_pad != rows:
            xw = jnp.pad(xw, ((0, rows_pad - rows), (0, 0)))

    sums, sqs = pl.pallas_call(
        _global_std_kernel,
        out_shape=(jax.ShapeDtypeStruct((cores, 1, w), jnp.float32),
                   jax.ShapeDtypeStruct((cores, 1, w), jnp.float32)),
        grid=(cores, tiles_per_core),
        in_specs=[pl.BlockSpec((tr, w),
                               lambda c, i: (c * tiles_per_core + i, 0))],
        out_specs=(pl.BlockSpec((None, 1, w), lambda c, i: (c, 0, 0)),
                   pl.BlockSpec((None, 1, w), lambda c, i: (c, 0, 0))),
        compiler_params=pltpu.CompilerParams(
            dimension_semantics=("parallel", "arbitrary")),
    )(xw)

    # Tiny finalize in XLA: combine cores, unfold lanes, std (ddof=1), mean.
    s = jnp.sum(sums, axis=0)[0].reshape(fold, d).sum(axis=0)     # (d,)
    ss = jnp.sum(sqs, axis=0)[0].reshape(fold, d).sum(axis=0)     # (d,)
    mean = s / n
    # TODO(synk): E[x^2] - mean^2 can cancel for |mean| >> std; use a shifted
    # / two-pass scheme if inputs are far from zero-centered.
    var = (ss - n * mean * mean) / (n - 1.0)
    std = jnp.sqrt(jnp.maximum(var, 0.0))
    return factor * jnp.mean(std)


def within_cluster_pallas(inputs, assignments, factor, *, block_n=2048,
                          num_cores=2, ingest_dtype=None):
    """factor * mean_{k,d} sqrt(within-cluster weighted variance); streams N."""
    n, d = inputs.shape
    n2, k = assignments.shape
    assert n == n2

    x = inputs if ingest_dtype is None else inputs.astype(ingest_dtype)
    a = assignments if ingest_dtype is None else assignments.astype(ingest_dtype)

    if n <= block_n:
        tn, cores, tiles_per_core, n_pad = n, 1, 1, n
    else:
        tn = max(128, _round_up(min(block_n, n), 128))   # lane-dense A tiles
        num_tiles = _cdiv(n, tn)
        cores = num_cores if num_tiles >= num_cores else 1
        tiles_per_core = _cdiv(num_tiles, cores)
        n_pad = cores * tiles_per_core * tn

    if n_pad != n:
        # zero-padded rows carry zero assignment weight -> no contribution
        x = jnp.pad(x, ((0, n_pad - n), (0, 0)))
        a = jnp.pad(a, ((0, n_pad - n), (0, 0)))
    at = a.T                                             # (K, N): no in-kernel transpose

    w = 2 * d + 1
    acc = pl.pallas_call(
        _within_cluster_kernel,
        out_shape=jax.ShapeDtypeStruct((cores, k, w), jnp.float32),
        grid=(cores, tiles_per_core),
        in_specs=[pl.BlockSpec((k, tn),
                               lambda c, i: (0, c * tiles_per_core + i)),
                  pl.BlockSpec((tn, d),
                               lambda c, i: (c * tiles_per_core + i, 0))],
        out_specs=pl.BlockSpec((None, k, w), lambda c, i: (c, 0, 0)),
        compiler_params=pltpu.CompilerParams(
            dimension_semantics=("parallel", "arbitrary")),
    )(at, x)

    # Tiny finalize in XLA on a (K, 2D+1) array.
    acc = jnp.sum(acc, axis=0)                           # combine cores
    s1 = acc[:, :d]                                      # sum a*x    -> (K, D)
    s2 = acc[:, d:2 * d]                                 # sum a*x^2  -> (K, D)
    freq = acc[:, 2 * d:]                                # (K, 1)
    # NOTE: empty clusters (freq == 0) yield inf/NaN, matching the PyTorch
    # reference semantics; clamp freq with an eps if undesired.
    inv_f = 1.0 / freq
    centers = s1 * inv_f
    ex2 = s2 * inv_f
    # TODO(synk): E_k[x^2] - center^2 can cancel for |center| >> sigma; use a
    # shifted accumulation if features are far from zero-centered.
    var = jnp.maximum(ex2 - centers * centers, 0.0)
    return factor * jnp.mean(jnp.sqrt(var))


# ---------------------------------------------------------------------------
# AMISE module (JAX side)
# ---------------------------------------------------------------------------

class AMISE:
    def __init__(self, cfg: AMISEConfig, input_size, *, block_rows=2048,
                 block_n=2048, num_cores=2, ingest_dtype=None):
        self.cfg = cfg
        self.input_size = input_size
        self.block_rows = block_rows   # N-tile for the "global" estimator
        self.block_n = block_n         # N-tile for the "within_cluster" estimator
        self.num_cores = num_cores     # leading "parallel" grid axis (v7x megacore)
        self.ingest_dtype = ingest_dtype
        init = cfg.initial_value if cfg.initial_value is not None else float("nan")
        self.kernel_width = jnp.asarray(init, dtype=jnp.float32)  # buffer
        n, p = cfg.batch_size, input_size[0]
        self.factor = (4.0 / (n * (p + 2))) ** (1.0 / (p + 4))
        if cfg.std_estimator not in ("global", "within_cluster"):
            raise RuntimeError(
                f"Invalid estimator for standard deviation: {cfg.std_estimator}.")

    def __call__(self, inputs=None, distances=None, assignments=None):
        if self.cfg.std_estimator == "global":
            return global_std_pallas(inputs, self.factor,
                                     block_rows=self.block_rows,
                                     num_cores=self.num_cores,
                                     ingest_dtype=self.ingest_dtype)
        return within_cluster_pallas(inputs, assignments, self.factor,
                                     block_n=self.block_n,
                                     num_cores=self.num_cores,
                                     ingest_dtype=self.ingest_dtype)

    def update_buffer(self, new):
        m = self.cfg.momentum
        self.kernel_width = m * self.kernel_width + (1.0 - m) * new


# ---------------------------------------------------------------------------
# main
# ---------------------------------------------------------------------------

if __name__ == "__main__":
    key = jax.random.PRNGKey(0)
    N, D, K = 512, 32, 8
    k1, k2 = jax.random.split(key)
    inputs = jax.random.normal(k1, (N, D), dtype=jnp.float32)
    logits = jax.random.normal(k2, (N, K), dtype=jnp.float32)
    assignments = jax.nn.softmax(logits, axis=-1)

    cfg_wc = AMISEConfig(batch_size=N, std_estimator="within_cluster")
    cfg_gl = AMISEConfig(batch_size=N, std_estimator="global")

    # small tiles: exercise the multi-step accumulator grid AND the 2-way
    # "parallel" core axis (grid = (2, 2) in both cases)
    amise_wc = AMISE(cfg_wc, input_size=(D,), block_n=128)
    amise_gl = AMISE(cfg_gl, input_size=(D,), block_rows=32)
    out_wc = jax.block_until_ready(amise_wc(inputs=inputs, assignments=assignments))
    out_gl = jax.block_until_ready(amise_gl(inputs=inputs, assignments=assignments))

    # default big-tile path (single tile, single core)
    amise_wc_big = AMISE(cfg_wc, input_size=(D,))
    amise_gl_big = AMISE(cfg_gl, input_size=(D,))
    out_wc_big = jax.block_until_ready(amise_wc_big(inputs=inputs, assignments=assignments))
    out_gl_big = jax.block_until_ready(amise_gl_big(inputs=inputs, assignments=assignments))

    # pure-JAX references (mirror the PyTorch math exactly)
    def ref_within_cluster(x, a, factor):
        freq = a.sum(axis=0, keepdims=True)                    # (1, K)
        centers = a.T @ x / freq.T                             # (K, D)
        sq = (x[:, None, :] - centers[None, :, :]) ** 2        # (N, K, D)
        wsd = a[:, :, None] * sq / freq[:, :, None]
        return factor * jnp.sqrt(wsd.sum(axis=0)).mean()

    def ref_global(x, factor):
        return factor * jnp.std(x, axis=0, ddof=1).mean()      # torch.std is unbiased

    ref_wc = ref_within_cluster(inputs, assignments, amise_wc.factor)
    ref_gl = ref_global(inputs, amise_gl.factor)

    assert jnp.allclose(out_wc, ref_wc, rtol=1e-4, atol=1e-5), (out_wc, ref_wc)
    assert jnp.allclose(out_gl, ref_gl, rtol=1e-4, atol=1e-5), (out_gl, ref_gl)
    assert jnp.allclose(out_wc_big, ref_wc, rtol=1e-4, atol=1e-5), (out_wc_big, ref_wc)
    assert jnp.allclose(out_gl_big, ref_gl, rtol=1e-4, atol=1e-5), (out_gl_big, ref_gl)

    # exercise the EMA buffer update (pure JAX, no kernel needed)
    amise_wc.update_buffer(out_wc)

    print("KERNEL_OK")
</pallas_src>

<mosaic_0001>
module attributes {stable_mosaic.version = 11 : i64} {
  func.func @_within_cluster_kernel(%arg0: i32, %arg1: i32, %arg2: memref<8x128xf32, #tpu.memory_space<vmem>>, %arg3: memref<128x32xf32, #tpu.memory_space<vmem>>, %arg4: memref<1x8x65xf32, #tpu.memory_space<vmem>>) attributes {dimension_semantics = [#tpu.dimension_semantics<parallel>, #tpu.dimension_semantics<arbitrary>], iteration_bounds = array<i64: 2, 2>, scalar_prefetch = 0 : i64, scratch_operands = 0 : i64, tpu.core_type = #tpu.core_type<tc>, window_params = [{transform_indices = @transform_0, window_bounds = array<i64: 8, 128>}, {transform_indices = @transform_1, window_bounds = array<i64: 128, 32>}, {transform_indices = @transform_2, window_bounds = array<i64: 1, 8, 65>}]} {
    %c0_i32 = arith.constant 0 : i32
    %0 = arith.cmpi eq, %arg1, %c0_i32 : i32
    %1 = arith.extui %0 : i1 to i32
    %c0_i32_0 = arith.constant 0 : i32
    %2 = arith.cmpi ne, %1, %c0_i32_0 : i32
    scf.if %2 {
      %cst_11 = arith.constant 0.000000e+00 : f32
      %15 = vector.broadcast %cst_11 : f32 to vector<8x65xf32>
      %c0_12 = arith.constant 0 : index
      %c0_13 = arith.constant 0 : index
      %c0_14 = arith.constant 0 : index
      %16 = vector.load %arg4[%c0_12, %c0_13, %c0_14] : memref<1x8x65xf32, #tpu.memory_space<vmem>>, vector<1x8x65xf32>
      %17 = vector.shape_cast %16 : vector<1x8x65xf32> to vector<8x65xf32>
      %18 = vector.shape_cast %15 : vector<8x65xf32> to vector<1x8x65xf32>
      tpu.vector_store %arg4[%c0_12, %c0_13, %c0_14], %18 {strides = array<i32>} : memref<1x8x65xf32, #tpu.memory_space<vmem>>, vector<1x8x65xf32>,
    } else {
    }
    %c0 = arith.constant 0 : index
    %c0_1 = arith.constant 0 : index
    %3 = vector.load %arg2[%c0, %c0_1] : memref<8x128xf32, #tpu.memory_space<vmem>>, vector<8x128xf32>
    %c0_2 = arith.constant 0 : index
    %c0_3 = arith.constant 0 : index
    %4 = vector.load %arg3[%c0_2, %c0_3] : memref<128x32xf32, #tpu.memory_space<vmem>>, vector<128x32xf32>
    %cst = arith.constant 1.000000e+00 : f32
    %5 = vector.broadcast %cst : f32 to vector<128x1xf32>
    %6 = arith.mulf %4, %4 : vector<128x32xf32>
    %7 = tpu.concatenate %4, %6, %5 in 1 : vector<128x32xf32>, vector<128x32xf32>, vector<128x1xf32> -> vector<128x65xf32>
    %c0_4 = arith.constant 0 : index
    %c0_5 = arith.constant 0 : index
    %c0_6 = arith.constant 0 : index
    %8 = vector.load %arg4[%c0_4, %c0_5, %c0_6] : memref<1x8x65xf32, #tpu.memory_space<vmem>>, vector<1x8x65xf32>
    %9 = vector.shape_cast %8 : vector<1x8x65xf32> to vector<8x65xf32>
    %cst_7 = arith.constant dense<0.000000e+00> : vector<8x65xf32>
    %10 = tpu.matmul %3, %7, %cst_7 {dimension_numbers = #tpu.dot_dimension_numbers<[1], [0], [0], [1], [0, 0, 1, 1], [], []>} : vector<8x128xf32>, vector<128x65xf32>, vector<8x65xf32> -> vector<8x65xf32>
    %11 = arith.addf %9, %10 : vector<8x65xf32>
    %c0_8 = arith.constant 0 : index
    %c0_9 = arith.constant 0 : index
    %c0_10 = arith.constant 0 : index
    %12 = vector.load %arg4[%c0_8, %c0_9, %c0_10] : memref<1x8x65xf32, #tpu.memory_space<vmem>>, vector<1x8x65xf32>
    %13 = vector.shape_cast %12 : vector<1x8x65xf32> to vector<8x65xf32>
    %14 = vector.shape_cast %11 : vector<8x65xf32> to vector<1x8x65xf32>
    tpu.vector_store %arg4[%c0_8, %c0_9, %c0_10], %14 {strides = array<i32>} : memref<1x8x65xf32, #tpu.memory_space<vmem>>, vector<1x8x65xf32>,
    return
  }
  func.func @transform_0(%arg0: i32, %arg1: i32) -> (i32, i32) {
    %c2_i32 = arith.constant 2 : i32
    %0 = arith.muli %arg0, %c2_i32 : i32
    %1 = arith.addi %0, %arg1 : i32
    %c0_i32 = arith.constant 0 : i32
    %c0_i32_0 = arith.constant 0 : i32
    return %c0_i32, %1 : i32, i32
  }
  func.func @transform_1(%arg0: i32, %arg1: i32) -> (i32, i32) {
    %c2_i32 = arith.constant 2 : i32
    %0 = arith.muli %arg0, %c2_i32 : i32
    %1 = arith.addi %0, %arg1 : i32
    %c0_i32 = arith.constant 0 : i32
    %c0_i32_0 = arith.constant 0 : i32
    return %1, %c0_i32 : i32, i32
  }
  func.func @transform_2(%arg0: i32, %arg1: i32) -> (i32, i32, i32) {
    %c0_i32 = arith.constant 0 : i32
    %c0_i32_0 = arith.constant 0 : i32
    %c0_i32_1 = arith.constant 0 : i32
    return %arg0, %c0_i32, %c0_i32_0 : i32, i32, i32
  }
}

</mosaic_0001>

<bundles_post_ra>
// kernel: tpu_custom_call.1
= control target key start
LH: loop header
LB: loop body
LE: loop exit
PB: predicated region body
PF: predicated region fallthrough
CT: control target
= control target key end

     0   :  { %7 = vsyncpa [#allocation3], 0  ;;  %s963_s0 = inlined_call_operand.vmem [shape: f32[8,512], index: 0, kind: input, shape index: {}]   ;;  %s964_s1 = inlined_call_operand.vmem [shape: f32[512,32], index: 1, kind: input, shape index: {}]   ;;  %s965_s2 = inlined_call_operand.hbm [shape: f32[2,8,65], index: 2, kind: output, shape index: {}]  }
   0x1   :  { %9 = vsyncpa [#allocation3 + $0x1], 0  ;;  %s706_s9 = smov 0   ;;  %s708_s10 = smov 0  }
   0x2   :  { %s710_s11 = smov 0   ;;  %s712_s12 = smov 0  }
   0x3   :  { %s714_s13 = smov 0   ;;  %s716_s14 = smov 0  }
   0x4   :  { %s718_s15 = smov 0   ;;  %s720_s16 = smov 0  }
   0x5 LB: > { %s460_s17 = sadd.s32 4294967295, %s687_s16   ;;  %s461_s18 = sadd.s32 4294967294, %s687_s16   ;;  %s687_s16 = sphi %s720_s16, %s15_s16   ;;  %s683_s15 = sphi %s718_s15, %s974_s15   ;;  %s679_s14 = sphi %s716_s14, %s973_s14   ;;  %s675_s13 = sphi %s714_s13, %s972_s13   ;;  %s671_s12 = sphi %s712_s12, %s971_s12   ;;  %s667_s11 = sphi %s710_s11, %s970_s11   ;;  %s663_s10 = sphi %s708_s10, %s969_s10   ;;  %s659_s9 = sphi %s706_s9, %s968_s9  }
   0x6   : > { %s24_s19 = sadd.s32 1, %s679_s14  ;;  %s27_s20 = sadd.s32 1, %s683_s15 }
   0x7   : > { %p25_p0 = scmp.ge.s32.totalorder %s24_s19, 2  ;;  %p104_p1 = scmp.ne.s32.totalorder %s667_s11, %s663_s10 }
   0x8   : > { %p105_p2 = scmp.eq.s32.totalorder %s460_s17, 3  ;;  %p110_p4 = scmp.ne.s32.totalorder %s663_s10, %s659_s9 }
   0x9   : > { %s976_s19 = smov (%p25_p0, %s24_s19), 0  ;;  %s978_s20 = smov (!%p25_p0, %s27_s20), %s683_s15 }
   0xa   : > { %p755_p3 = por %p105_p2, %p104_p1  ;;  %p29_p5 = scmp.ge.s32.totalorder %s978_s20, 2 }
   0xb   : > { %p111_p6 = scmp.eq.s32.totalorder %s461_s18, 3  ;;  %p468_p7 = scmp.ge.s32.totalorder %s687_s16, 1 }
   0xc   : > { %p153_p8 = scmp.lt.s32.totalorder %s687_s16, 5  ;;  %s980_s20 = smov (%p29_p5, %s978_s20), 0 }
   0xd   : > { %p765_p9 = por %p111_p6, %p110_p4  ;;  %s91_s23 = ssub.s32 %s683_s15, %s980_s20 }
   0xe   : > { %p154_p10 = pnand %p468_p7, %p153_p8  ;;  %s94_s24 = sadd.s32 1, %s667_s11 }
   0xf   : > { %p92_p11 = scmp.eq.s32.totalorder %s91_s23, 0  ;;  %s180_s26 = sand.u32 (!%p154_p10), 1, %s663_s10  }
  0x10   : > { %157 = sbr.rel (%p154_p10) target bundleno = 321 (0x141), region = 28  ;;  %s470_s27 = sshll.u32 (!%p154_p10), %s675_s13, 1 }
  0x11   : > { %s773_s25 = scalar_select %p92_p11, %s667_s11, %s94_s24  }
  0x12   : > { %s469_s28 = sshll.u32 (!%p154_p10), %s180_s26, 3  ;;  %s184_s29 = sadd.s32 (!%p154_p10), %s671_s12, %s470_s27 }
  0x13   : > { %p185_p12 = scmp.lt.s32.totalorder (!%p154_p10), %s184_s29, 3  ;;  %s473_s30 = sshll.u32 (!%p154_p10), %s184_s29, 4 }
  0x14   : > { %p194_p13 = scmp.lt.s32.totalorder (!%p154_p10), %s473_s30, 63  ;;  %s790_s23 = scalar_lea.vmem (!%p154_p10), [#allocation2], %s469_s28 }
  0x15   : > { %s982_s29 = smov (!%p185_p12, %s184_s29), 3  ;;  %p475_p0 = scmp.ne.s32.totalorder %s671_s12, 0 }
  0x16   : > { %s471_s3 = sshll.u32 %s982_s29, 3  ;;  %s984_s30 = smov (!%p194_p13, %s473_s30), 63 }
  0x17   : > { %s783_s6 = scalar_lea.vmem %s963_s0, %s471_s3  ;;  %s474_s7 = sshll.u32 %s984_s30, 3 }
  0x18   : > { %s788_s18 = scalar_lea.vmem %s964_s1, %s474_s7  ;;  %204 = sbr.rel (%p475_p0) target bundleno = 31 (0x1f), region = 32 }
  0x1d   : > { %vm205_vm0 = vcmask 531456   ;;  %v689_v0 = vmov 0.0  }
  0x1e   : > { %206 = vst.msk [vmem:[%s790_s23] sm:$0xff] %vm205_vm0, %v689_v0 }
  0x1f PF: > { %v222_v1 = vld [vmem:[%s788_s18 + $0x70] sm:$0xff]  ;;  %v223_v2 = vld [vmem:[%s788_s18 + $0x78] sm:$0xff]  ;;  %v803_v7 = vld [vmem:[%s788_s18 + $0x60] sm:$0xff]  ;;  %s690_s12 = smov 32   ;;  %vm304_vm1 = vcmask 261120   ;;  %vm321_vm2 = vcmask 523264  }
  0x20   : > { %v238_v3 = vmul.f32 %v222_v1, %v222_v1  ;;  %v239_v4 = vmul.f32 %v223_v2, %v223_v2  ;;  %v797_v5 = vld [vmem:[%s788_s18 + $0x50] sm:$0xff]  ;;  %v800_v6 = vld [vmem:[%s788_s18 + $0x58] sm:$0xff]  ;;  %v221_v8 = vld [vmem:[%s788_s18 + $0x68] sm:$0xff]  ;;  %v236_v17 = vmul.f32 %v803_v7, %v803_v7  ;;  %s477_s24 = sshll.u32 %s675_s13, 3  ;;  %s375_s30 = sshll.u32 %s790_s23, 4  ;;  %vm360_vm3 = vcmask 531456   ;;  %s376_s30 = int_to_ptr.vmem [resolvable:$true] %s375_s30 }
  0x21   : > { %v234_v9 = vmul.f32 %v797_v5, %v797_v5  ;;  %v235_v10 = vmul.f32 %v800_v6, %v800_v6  ;;  %v811_v12 = vld [vmem:[%s788_s18 + $0x40] sm:$0xff]  ;;  %v814_v13 = vld [vmem:[%s788_s18 + $0x48] sm:$0xff]  ;;  %v817_v15 = vld [vmem:[%s788_s18 + $0x30] sm:$0xff]  ;;  %v237_v18 = vmul.f32 %v221_v8, %v221_v8  ;;  %s373_s29 = scalar_lea.hbm %s965_s2, %s477_s24  ;;  %s363_s4 = scalar_lea.sflag [#allocation3], %s180_s26 }
  0x22   : > { %v553_v11 = vpack.i.bf16 %v238_v3, %v239_v4  ;;  %v820_v16 = vld [vmem:[%s788_s18 + $0x38] sm:$0xff]  ;;  %v230_v19 = vmul.f32 %v817_v15, %v817_v15  ;;  %v232_v21 = vmul.f32 %v811_v12, %v811_v12  ;;  %v233_v22 = vmul.f32 %v814_v13, %v814_v13  ;;  %v835_v23 = vld [vmem:[%s788_s18 + $0x20] sm:$0xff]  ;;  %v838_v24 = vld [vmem:[%s788_s18 + $0x28] sm:$0xff]  ;;  %s377_s3 = sshll.u32 %s373_s29, 4  ;;  %s613_s8 = scalar_lea.hbm %s965_s2, 16  ;;  %s378_s3 = int_to_ptr.hbm [resolvable:$true] %s377_s3 }
  0x23   : > { %v563_v14 = vpack.i.bf16 %v234_v9, %v235_v10  ;;  %v231_v20 = vmul.f32 %v820_v16, %v820_v16  ;;  %v558_v26 = vpack.i.bf16 %v236_v17, %v237_v18  ;;  %v228_v27 = vmul.f32 %v835_v23, %v835_v23  ;;  %v846_v30 = vld [vmem:[%s788_s18 + $0x10] sm:$0xff]  ;;  %v849_v31 = vld [vmem:[%s788_s18 + $0x18] sm:$0xff]  ;;  %v852_v32 = vld [vmem:[%s788_s18] sm:$0xff]  ;;  %s607_s5 = sshra.s32 %s378_s3, 4  ;;  %s608_s5 = int_to_ptr.hbm [resolvable:$true] %s607_s5 }
  0x24   : > { %554 = vrot.lane.b32.xlu0 %v553_v11, %s690_s12  ;;  %v229_v28 = vmul.f32 %v838_v24, %v838_v24  ;;  %v568_v29 = vpack.i.bf16 %v232_v21, %v233_v22  ;;  %v855_v33 = vld [vmem:[%s788_s18 + $0x8] sm:$0xff]  ;;  %v226_v34 = vmul.f32 %v846_v30, %v846_v30  ;;  %v227_v35 = vmul.f32 %v849_v31, %v849_v31  ;;  %p614_p5 = scmp.lt.s32.totalorder %s608_s5, %s965_s2 }
  0x25   : > { %564 = vrot.lane.b32.xlu1 %v563_v14, %s690_s12  ;;  %v573_v25 = vpack.i.bf16 %v230_v19, %v231_v20  ;;  %v224_v37 = vmul.f32 %v852_v32, %v852_v32  ;;  %v225_v38 = vmul.f32 %v855_v33, %v855_v33 }
  0x26   : > { %v578_v36 = vpack.i.bf16 %v228_v27, %v229_v28  ;;  %v583_v39 = vpack.i.bf16 %v226_v34, %v227_v35  ;;  %v207_v35 = vld [vmem:[%s783_s6] sm:$0xff]  ;;  %s609_s6 = scalar_lea.hbm %s608_s5, 8 }
  0x27   : > { %574 = vrot.lane.b32.xlu2 %v573_v25, %s690_s12  ;;  %v588_v40 = vpack.i.bf16 %v224_v37, %v225_v38  ;;  %p610_p1 = scmp.ne.s32.totalorder %s608_s5, %s609_s6  ;;  %p615_p6 = scmp.lt.s32.totalorder %s613_s8, %s609_s6 }
  0x29   : > { %p611_p2 = pnand %p610_p1, %p755_p3  ;;  %p616_p7 = por %p615_p6, %p614_p5 }
  0x2b   : > { %p612_p4 = pneg %p611_p2 }
  0x2c   : > { %559 = vrot.lane.b32.xlu0 %v558_v26, %s690_s12 }
  0x2d   : > { %569 = vrot.lane.b32.xlu1 %v568_v29, %s690_s12  ;;  %p617_p8 = pnand %p616_p7, %p612_p4 }
  0x2f   : > { %579 = vrot.lane.b32.xlu2 %v578_v36, %s690_s12 }
  0x34   : > { %584 = vrot.lane.b32.xlu0 %v583_v39, %s690_s12 }
  0x35   : > { %589 = vrot.lane.b32.xlu1 %v588_v40, %s690_s12 }
  0x81   : > { %v575_v49 = vpop.permute.xlu2 %574 }
  0x82   : > { %v576_v3 = vunpack.i.l.bf16 %v575_v49 }
  0x96   : > { %v555_v41 = vpop.permute.xlu0 %554 }
  0x97   : > { %v557_v42 = vunpack.i.h.bf16 %v555_v41  ;;  %v556_v43 = vunpack.i.l.bf16 %v555_v41  ;;  %v565_v44 = vpop.permute.xlu1 %564 }
  0x98   : > { %v566_v53 = vunpack.i.l.bf16 %v565_v44  ;;  %v567_v55 = vunpack.i.h.bf16 %v565_v44 }
  0x99   : > { %v320_v45 = vsel %vm304_vm1, %v223_v2, %v556_v43  ;;  %v319_v46 = vsel %vm304_vm1, %v222_v1, %v557_v42  ;;  %v580_v2 = vpop.permute.xlu2 %579 }
  0x9a   : > { %v337_v47 = vsel %vm321_vm2, %v320_v45, 1.0  ;;  %v336_v48 = vsel %vm321_vm2, %v319_v46, 1.0  ;;  %v316_v60 = vsel %vm304_vm1, %v800_v6, %v566_v53  ;;  %v315_v63 = vsel %vm304_vm1, %v797_v5, %v567_v55 }
  0x9b   : > { %339 = vmatpush.msra.mxu0 %v337_v47  ;;  %v333_v1 = vsel %vm321_vm2, %v316_v60, 1.0  ;;  %v332_v4 = vsel %vm321_vm2, %v315_v63, 1.0  ;;  %v577_v6 = vunpack.i.h.bf16 %v575_v49  ;;  %v581_v9 = vunpack.i.l.bf16 %v580_v2 }
  0x9c   : > { %v312_v5 = vsel %vm304_vm1, %v820_v16, %v576_v3 }
  0x9d   : > { %340 = vmatpush.msra.mxu0 %v336_v48  ;;  %v311_v14 = vsel %vm304_vm1, %v817_v15, %v577_v6  ;;  %v310_v18 = vsel %vm304_vm1, %v838_v24, %v581_v9  ;;  %v329_v19 = vsel %vm321_vm2, %v312_v5, 1.0 }
  0x9e   : > { %v560_v50 = vpop.permute.xlu0 %559  ;;  %v328_v20 = vsel %vm321_vm2, %v311_v14, 1.0  ;;  %v327_v21 = vsel %vm321_vm2, %v310_v18, 1.0 }
  0x9f   : > { %v562_v51 = vunpack.i.h.bf16 %v560_v50  ;;  %v561_v52 = vunpack.i.l.bf16 %v560_v50  ;;  %v570_v54 = vpop.permute.xlu1 %569 }
  0xa0   : > { %v571_v58 = vunpack.i.l.bf16 %v570_v54  ;;  %v572_v62 = vunpack.i.h.bf16 %v570_v54 }
  0xa1   : > { %v318_v56 = vsel %vm304_vm1, %v221_v8, %v561_v52  ;;  %v317_v57 = vsel %vm304_vm1, %v803_v7, %v562_v51 }
  0xa2   : > { %v335_v59 = vsel %vm321_vm2, %v318_v56, 1.0  ;;  %v334_v61 = vsel %vm321_vm2, %v317_v57, 1.0  ;;  %v314_v0 = vsel %vm304_vm1, %v814_v13, %v571_v58  ;;  %v313_v8 = vsel %vm304_vm1, %v811_v12, %v572_v62 }
  0xa3   : > { %341 = vmatpush.msra.mxu0 %v335_v59  ;;  %v331_v7 = vsel %vm321_vm2, %v314_v0, 1.0  ;;  %v330_v11 = vsel %vm321_vm2, %v313_v8, 1.0  ;;  %v582_v13 = vunpack.i.h.bf16 %v580_v2 }
  0xa5   : > { %342 = vmatpush.msra.mxu0 %v334_v61  ;;  %v309_v22 = vsel %vm304_vm1, %v835_v23, %v582_v13 }
  0xa6   : > { %v585_v10 = vpop.permute.xlu0 %584  ;;  %v326_v24 = vsel %vm321_vm2, %v309_v22, 1.0 }
  0xa7   : > { %343 = vmatpush.msra.mxu0 %v333_v1  ;;  %v586_v17 = vunpack.i.l.bf16 %v585_v10  ;;  %v590_v12 = vpop.permute.xlu1 %589  ;;  %v587_v16 = vunpack.i.h.bf16 %v585_v10 }
  0xa8   : > { %v591_v25 = vunpack.i.l.bf16 %v590_v12  ;;  %v592_v27 = vunpack.i.h.bf16 %v590_v12 }
  0xa9   : > { %344 = vmatpush.msra.mxu0 %v332_v4  ;;  %v308_v15 = vsel %vm304_vm1, %v849_v31, %v586_v17  ;;  %v307_v28 = vsel %vm304_vm1, %v846_v30, %v587_v16  ;;  %v338_v30 = vld [vmem:[%s790_s23] sm:$0xff] }
  0xaa   : > { %v325_v26 = vsel %vm321_vm2, %v308_v15, 1.0  ;;  %v306_v23 = vsel %vm304_vm1, %v855_v33, %v591_v25  ;;  %v324_v29 = vsel %vm321_vm2, %v307_v28, 1.0  ;;  %v305_v34 = vsel %vm304_vm1, %v852_v32, %v592_v27 }
  0xab   : > { %345 = vmatpush.msra.mxu0 %v331_v7  ;;  %v323_v31 = vsel %vm321_vm2, %v306_v23, 1.0  ;;  %v322_v36 = vsel %vm321_vm2, %v305_v34, 1.0 }
  0xad   : > { %346 = vmatpush.msra.mxu0 %v330_v11 }
  0xaf   : > { %347 = vmatpush.msra.mxu0 %v329_v19 }
  0xb1   : > { %348 = vmatpush.msra.mxu0 %v328_v20 }
  0xb3   : > { %349 = vmatpush.msra.mxu0 %v327_v21 }
  0xb5   : > { %350 = vmatpush.msra.mxu0 %v326_v24 }
  0xb7   : > { %351 = vmatpush.msra.mxu0 %v325_v26 }
  0xb9   : > { %352 = vmatpush.msra.mxu0 %v324_v29 }
  0xbb   : > { %353 = vmatpush.msra.mxu0 %v323_v31 }
  0xbd   : > { %354 = vmatpush.msra.mxu0 %v322_v36 }
  0xbe   : > { %355 = vmatmul.f32.vlgmr.msra.gmra.mxu0 %v207_v35 }
 0x13b   : > { %v356_v33 = vpop.f32.mrf.mxu0 }
 0x13c   : > { %v359_v32 = vadd.f32 %v356_v33, %v338_v30 }
 0x13e   : > { %361 = vst.msk [vmem:[%s790_s23] sm:$0xff] %vm360_vm3, %v359_v32 }
 0x13f   : > { %620 = shalt.err (!%p617_p8)
}
 0x140   : > { %480 = dma.vmem_to_hbm [thread:$0]  (%p755_p3), %s376_s30, 128, %s378_s3, %s363_s4  }
 0x141 PF: > { %p486_p10 = scmp.ge.s32.totalorder %s687_s16, 2  ;;  %s389_s26 = sand.u32 1, %s659_s9  }
 0x142   : > { %s390_s23 = scalar_lea.sflag [#allocation3], %s389_s26 }
 0x143   : > { %p483_p11 = pnand %p486_p10, %p765_p9 }
 0x145   : > { %p484_p12 = pneg %p483_p11 }
 0x147   : > { %654 = dma.done.wait (%p484_p12), %s390_s23, 128  }
 0x148   : > { %656 = vsyncadd (%p484_p12), %s390_s23, 4294967168  ;;  %s15_s16 = sadd.s32 1, %s687_s16   ;;  %s968_s9 = smov %s663_s10 }
 0x149   : > { %p12_p13 = scmp.ge.s32.totalorder %s15_s16, 6   ;;  %s969_s10 = smov %s667_s11 }
 0x14a   : > { %s970_s11 = smov %s773_s25  ;;  %s971_s12 = smov %s679_s14 }
 0x14b   : > { %s972_s13 = smov %s683_s15  ;;  %s973_s14 = smov %s976_s19 }
 0x14c   : > { %s974_s15 = smov %s980_s20  ;;  %14 = sbr.rel (!%p12_p13) target bundleno = 5 (0x5), region = 70 }
 0x151   :  { %396 = vsyncpa [#allocation3], 1 }
 0x152   :  { %398 = vsyncpa [#allocation3 + $0x1], 1 }

</bundles_post_ra>
